<compile_context>
chip_gen: v7x
topology: tpu7x:2x2x1
jax: 0.10.0
libtpu: 0.0.40
codegen_flags: <defaults>
</compile_context>

<pallas_src>
import functools
import math

import jax
import jax.numpy as jnp
import numpy as np
from jax.experimental import pallas as pl
from jax.experimental.pallas import tpu as pltpu


# ---------------------------------------------------------------------------
# Pallas kernel (whole decoder layer, one grid step)
# ---------------------------------------------------------------------------
def _decoder_layer_kernel(
    x_ref,       # (BS, H)            residual input
    rowc_ref,    # (BS, 6H + nH*BS)   lanes: cos(3H) | sin(3H) | additive score mask
    w6_ref,      # (H, 6H)            [Wq|Wk|Wv | rot(Wq)|rot(Wk)|0], scale folded
    vec_ref,     # (8, 6H)            row0=b6, row1=[g1|g2|..], row2=[be1|be2|..]
    wo_ref,      # (H, H)             O projection (no bias)
    wgu_ref,     # (H, 2I)            fused gate|up weights
    wd_ref,      # (I, H)             down projection
    kvmask_ref,  # (nH*BS, H)         head-lane selection / softmax-denominator matrix
    o_ref,       # (BS, H)
    *, num_heads: int, eps: float,
):
    BS, H = x_ref.shape
    I = wd_ref.shape[0]
    H3 = 3 * H

    x = x_ref[...]                                       # (BS, H)

    b6 = vec_ref[0:1, :]                                 # (1, 6H)
    g1 = vec_ref[1:2, 0:H]
    g2 = vec_ref[1:2, H:2 * H]
    be1 = vec_ref[2:3, 0:H]
    be2 = vec_ref[2:3, H:2 * H]

    # ---- LayerNorm 1 -------------------------------------------------------
    mu = jnp.mean(x, axis=-1, keepdims=True)
    var = jnp.mean((x - mu) ** 2, axis=-1, keepdims=True)
    xn = (x - mu) * jax.lax.rsqrt(var + eps) * g1 + be1

    # ---- Fused QKV + rotate_half projection (one matmul) --------------------
    qkv6 = jnp.dot(xn, w6_ref[...], preferred_element_type=jnp.float32) + b6

    # ---- RoPE as a single elementwise FMA (v lanes pass through: cos=1,sin=0)
    cos = rowc_ref[:, 0:H3]
    sin = rowc_ref[:, H3:2 * H3]
    smask = rowc_ref[:, 2 * H3:]                         # (BS, nH*BS) additive mask
    qkv = qkv6[:, 0:H3] * cos + qkv6[:, H3:2 * H3] * sin  # (BS, 3H)

    q = qkv[:, 0:H]                                      # (BS, H), already scaled
    kv = qkv[:, H:H3]                                    # (BS, 2H) = [k | v]

    # ---- Heads stacked on sublanes: replicate k,v per head, select head lanes
    kvmask = kvmask_ref[...]                             # (nH*BS, H) 0/1
    kvbig = jnp.concatenate([kv] * num_heads, axis=0)    # (nH*BS, 2H)
    kbig = kvbig[:, 0:H] * kvmask
    vbig = kvbig[:, H:2 * H] * kvmask

    # ---- Attention: one score matmul, one softmax, one PV matmul ------------
    # s[r, h*BS + t] = q_h(r) . k_h(t)   (scale folded into Wq/bq host-side)
    s = jax.lax.dot_general(q, kbig, (((1,), (1,)), ((), ())),
                            preferred_element_type=jnp.float32) + smask
    s = s - jnp.max(s, axis=-1, keepdims=True)           # per-segment shift-invariant
    p = jnp.exp(s)                                       # masked entries -> 0

    attn_un = jnp.dot(p, vbig, preferred_element_type=jnp.float32)   # (BS, H)
    denom = jnp.dot(p, kvmask, preferred_element_type=jnp.float32)   # (BS, H) per-head sums
    # Exact divide kept to preserve the f32-vs-PyTorch match.
    # TODO(synk): pl.reciprocal(denom, approx=True) once an accuracy budget allows.
    attn = attn_un / denom

    # ---- O projection (single dot) + residual --------------------------------
    h1 = x + jnp.dot(attn, wo_ref[...], preferred_element_type=jnp.float32)

    # ---- LayerNorm 2 ---------------------------------------------------------
    mu2 = jnp.mean(h1, axis=-1, keepdims=True)
    var2 = jnp.mean((h1 - mu2) ** 2, axis=-1, keepdims=True)
    hn = (h1 - mu2) * jax.lax.rsqrt(var2 + eps) * g2 + be2

    # ---- SwiGLU MLP (fused gate|up) + residual -------------------------------
    gu = jnp.dot(hn, wgu_ref[...], preferred_element_type=jnp.float32)  # (BS, 2I)
    gate = gu[:, 0:I]
    up = gu[:, I:2 * I]
    mlp = jnp.dot(jax.nn.silu(gate) * up, wd_ref[...],
                  preferred_element_type=jnp.float32)
    o_ref[...] = h1 + mlp


# ---------------------------------------------------------------------------
# Wrapper
# ---------------------------------------------------------------------------
def sundial_decoder_layer(x, packed, *, num_heads, eps=1e-5):
    B, S, H = x.shape
    BS = B * S
    x2d = x.reshape(BS, H)

    kernel = functools.partial(_decoder_layer_kernel, num_heads=num_heads, eps=eps)

    def full(shape):
        return pl.BlockSpec(shape, lambda i, _s=shape: tuple(0 for _ in _s))

    out2d = pl.pallas_call(
        kernel,
        out_shape=jax.ShapeDtypeStruct((BS, H), jnp.float32),
        grid=(1,),
        in_specs=[
            full((BS, H)),                 # x
            full(packed["rowc"].shape),    # cos | sin | score mask
            full(packed["w6"].shape),      # fused qkv | rotated-qkv weights
            full(packed["vec"].shape),     # biases / LayerNorm vectors
            full(packed["wo"].shape),      # wo
            full(packed["wgu"].shape),     # fused gate|up
            full(packed["wd"].shape),      # wd
            full(packed["kvmask"].shape),  # head-lane selection matrix
        ],
        out_specs=full((BS, H)),
        compiler_params=pltpu.CompilerParams(
            dimension_semantics=("arbitrary",)),
    )(x2d, packed["rowc"], packed["w6"], packed["vec"], packed["wo"],
      packed["wgu"], packed["wd"], packed["kvmask"])

    return out2d.reshape(B, S, H)


# ---------------------------------------------------------------------------
# Parameter construction (deterministic), host-side packing, pure-JAX reference
# ---------------------------------------------------------------------------
def make_params(key, *, S, H, I, num_heads, base=10000.0):
    hd = H // num_heads
    ks = jax.random.split(key, 14)
    n = lambda k, shp: (0.05 * jax.random.normal(k, shp)).astype(jnp.float32)

    params = {
        # Linear weights stored already transposed: (in, out) so code does x @ W.
        "wq": n(ks[0], (H, H)), "bq": n(ks[1], (1, H)),
        "wk": n(ks[2], (H, H)), "bk": n(ks[3], (1, H)),
        "wv": n(ks[4], (H, H)), "bv": n(ks[5], (1, H)),
        "wo": n(ks[6], (H, H)),
        "g1": 1.0 + n(ks[7], (1, H)), "be1": n(ks[8], (1, H)),
        "g2": 1.0 + n(ks[9], (1, H)), "be2": n(ks[10], (1, H)),
        "wg": n(ks[11], (H, I)), "wu": n(ks[12], (H, I)), "wd": n(ks[13], (I, H)),
    }

    # Rotary cos/sin cache for positions [0, S), per head_dim.
    inv_freq = 1.0 / (base ** (np.arange(0, hd, 2, dtype=np.float32) / hd))
    t = np.arange(S, dtype=np.float32)
    freqs = np.outer(t, inv_freq)                      # (S, hd/2)
    emb = np.concatenate([freqs, freqs], axis=-1)      # (S, hd)
    params["cos_hd"] = jnp.asarray(np.cos(emb), jnp.float32)
    params["sin_hd"] = jnp.asarray(np.sin(emb), jnp.float32)
    return params


def pack_params(params, *, B, S, H, I, num_heads):
    """Host-side packing: fold rotate_half + attention scale into weights,
    precompute head-selection and cross-batch masks, pack small slabs."""
    hd = H // num_heads
    half = hd // 2
    BS = B * S
    scale = 1.0 / math.sqrt(hd)

    def np32(a):
        return np.asarray(a, dtype=np.float32)

    # Fold the 1/sqrt(head_dim) score scale into Wq / bq (RoPE is linear, so
    # this commutes with the rotation fold below).
    wq = np32(params["wq"]) * scale
    bq = np32(params["bq"]) * scale
    wk, bk = np32(params["wk"]), np32(params["bk"])
    wv, bv = np32(params["wv"]), np32(params["bv"])

    def rot_cols(w):
        # rotate_half applied in output-lane (column) space, per head block:
        # out[..., :half] = -in[..., half:], out[..., half:] = in[..., :half]
        out = np.zeros_like(w)
        for h in range(num_heads):
            o = h * hd
            out[..., o:o + half] = -w[..., o + half:o + hd]
            out[..., o + half:o + hd] = w[..., o:o + half]
        return out

    w6 = np.concatenate(
        [wq, wk, wv, rot_cols(wq), rot_cols(wk), np.zeros_like(wv)], axis=1)  # (H, 6H)
    b6 = np.concatenate(
        [bq, bk, bv, rot_cols(bq), rot_cols(bk), np.zeros_like(bv)], axis=1)  # (1, 6H)

    # cos/sin tiled over heads, lane-packed to match the (BS, 6H) qkv6 output.
    cos_t = np.tile(np32(params["cos_hd"]), (1, num_heads))   # (S, H)
    sin_t = np.tile(np32(params["sin_hd"]), (1, num_heads))
    cos3 = np.concatenate([cos_t, cos_t, np.ones((S, H), np.float32)], axis=1)
    sin3 = np.concatenate([sin_t, sin_t, np.zeros((S, H), np.float32)], axis=1)

    # Additive cross-batch mask, tiled per head along lanes: (BS, nH*BS).
    tok_batch = np.arange(BS) // S
    same = tok_batch[:, None] == tok_batch[None, :]
    smask = np.tile(np.where(same, 0.0, -1e30).astype(np.float32), (1, num_heads))

    rowc = np.concatenate(
        [np.tile(cos3, (B, 1)), np.tile(sin3, (B, 1)), smask], axis=1)  # (BS, 6H+nH*BS)

    # Head-lane selection matrix; doubles as the softmax-denominator matrix.
    head_of_row = np.repeat(np.arange(num_heads), BS)          # (nH*BS,)
    head_of_col = np.arange(H) // hd                           # (H,)
    kvmask = (head_of_row[:, None] == head_of_col[None, :]).astype(np.float32)

    vec = np.zeros((8, 6 * H), np.float32)
    vec[0, :] = b6[0]
    vec[1, 0:H] = np32(params["g1"])[0]
    vec[1, H:2 * H] = np32(params["g2"])[0]
    vec[2, 0:H] = np32(params["be1"])[0]
    vec[2, H:2 * H] = np32(params["be2"])[0]

    wgu = np.concatenate([np32(params["wg"]), np32(params["wu"])], axis=1)  # (H, 2I)

    return {
        "rowc": jnp.asarray(rowc),
        "w6": jnp.asarray(w6),
        "vec": jnp.asarray(vec),
        "wo": jnp.asarray(np32(params["wo"])),
        "wgu": jnp.asarray(wgu),
        "wd": jnp.asarray(np32(params["wd"])),
        "kvmask": jnp.asarray(kvmask),
    }


def reference_decoder_layer(x, params, *, num_heads, eps=1e-5):
    """Plain-JAX mirror of the PyTorch forward (for correctness checking)."""
    B, S, H = x.shape
    hd = H // num_heads

    def ln(z, g, b):
        mu = jnp.mean(z, -1, keepdims=True)
        var = jnp.mean((z - mu) ** 2, -1, keepdims=True)
        return (z - mu) / jnp.sqrt(var + eps) * g[0] + b[0]

    xn = ln(x, params["g1"], params["be1"])
    q = xn @ params["wq"] + params["bq"][0]
    k = xn @ params["wk"] + params["bk"][0]
    v = xn @ params["wv"] + params["bv"][0]

    def split(z):  # (B,S,H) -> (B,nH,S,hd)
        return z.reshape(B, S, num_heads, hd).transpose(0, 2, 1, 3)

    q, k, v = split(q), split(k), split(v)
    cos = params["cos_hd"][None, None]               # (1,1,S,hd)
    sin = params["sin_hd"][None, None]

    def rot_half(z):
        z1, z2 = z[..., : hd // 2], z[..., hd // 2:]
        return jnp.concatenate([-z2, z1], axis=-1)

    q = q * cos + rot_half(q) * sin
    k = k * cos + rot_half(k) * sin

    s = jnp.einsum("bhqd,bhkd->bhqk", q, k) / math.sqrt(hd)
    p = jax.nn.softmax(s, axis=-1)
    attn = jnp.einsum("bhqk,bhkd->bhqd", p, v)
    attn = attn.transpose(0, 2, 1, 3).reshape(B, S, H) @ params["wo"]

    h1 = x + attn
    hn = ln(h1, params["g2"], params["be2"])
    mlp = (jax.nn.silu(hn @ params["wg"]) * (hn @ params["wu"])) @ params["wd"]
    return h1 + mlp


# ---------------------------------------------------------------------------
if __name__ == "__main__":
    B, S, H, I = 2, 8, 32, 64
    NUM_HEADS = 4

    key = jax.random.PRNGKey(0)
    kx, kp = jax.random.split(key)
    x = jax.random.normal(kx, (B, S, H), dtype=jnp.float32)
    params = make_params(kp, S=S, H=H, I=I, num_heads=NUM_HEADS)
    packed = pack_params(params, B=B, S=S, H=H, I=I, num_heads=NUM_HEADS)

    out = sundial_decoder_layer(x, packed, num_heads=NUM_HEADS)
    out = jax.block_until_ready(out)

    ref = reference_decoder_layer(x, params, num_heads=NUM_HEADS)
    if not jnp.allclose(out, ref, atol=1e-4, rtol=1e-4):
        raise AssertionError(
            f"mismatch: max abs err = {jnp.max(jnp.abs(out - ref))}")

    print("KERNEL_OK")
</pallas_src>

<mosaic_0001>
module attributes {stable_mosaic.version = 11 : i64} {
  func.func @_decoder_layer_kernel(%arg0: i32, %arg1: memref<16x32xf32, #tpu.memory_space<vmem>>, %arg2: memref<16x256xf32, #tpu.memory_space<vmem>>, %arg3: memref<32x192xf32, #tpu.memory_space<vmem>>, %arg4: memref<8x192xf32, #tpu.memory_space<vmem>>, %arg5: memref<32x32xf32, #tpu.memory_space<vmem>>, %arg6: memref<32x128xf32, #tpu.memory_space<vmem>>, %arg7: memref<64x32xf32, #tpu.memory_space<vmem>>, %arg8: memref<64x32xf32, #tpu.memory_space<vmem>>, %arg9: memref<16x32xf32, #tpu.memory_space<vmem>>) attributes {dimension_semantics = [#tpu.dimension_semantics<arbitrary>], iteration_bounds = array<i64: 1>, scalar_prefetch = 0 : i64, scratch_operands = 0 : i64, tpu.core_type = #tpu.core_type<tc>, window_params = [{pipeline_mode = #tpu.pipeline_mode<synchronous>, transform_indices = @transform_0, window_bounds = array<i64: 16, 32>}, {pipeline_mode = #tpu.pipeline_mode<synchronous>, transform_indices = @transform_1, window_bounds = array<i64: 16, 256>}, {pipeline_mode = #tpu.pipeline_mode<synchronous>, transform_indices = @transform_2, window_bounds = array<i64: 32, 192>}, {pipeline_mode = #tpu.pipeline_mode<synchronous>, transform_indices = @transform_3, window_bounds = array<i64: 8, 192>}, {pipeline_mode = #tpu.pipeline_mode<synchronous>, transform_indices = @transform_4, window_bounds = array<i64: 32, 32>}, {pipeline_mode = #tpu.pipeline_mode<synchronous>, transform_indices = @transform_5, window_bounds = array<i64: 32, 128>}, {pipeline_mode = #tpu.pipeline_mode<synchronous>, transform_indices = @transform_6, window_bounds = array<i64: 64, 32>}, {pipeline_mode = #tpu.pipeline_mode<synchronous>, transform_indices = @transform_7, window_bounds = array<i64: 64, 32>}, {pipeline_mode = #tpu.pipeline_mode<synchronous>, transform_indices = @transform_8, window_bounds = array<i64: 16, 32>}]} {
    %c0 = arith.constant 0 : index
    %c0_0 = arith.constant 0 : index
    %0 = vector.load %arg1[%c0, %c0_0] : memref<16x32xf32, #tpu.memory_space<vmem>>, vector<16x32xf32>
    %c0_1 = arith.constant 0 : index
    %c0_2 = arith.constant 0 : index
    %1 = vector.load %arg4[%c0_1, %c0_2] : memref<8x192xf32, #tpu.memory_space<vmem>>, vector<1x192xf32>
    %c1 = arith.constant 1 : index
    %c0_3 = arith.constant 0 : index
    %2 = vector.load %arg4[%c1, %c0_3] : memref<8x192xf32, #tpu.memory_space<vmem>>, vector<1x32xf32>
    %c1_4 = arith.constant 1 : index
    %c32 = arith.constant 32 : index
    %3 = vector.load %arg4[%c1_4, %c32] : memref<8x192xf32, #tpu.memory_space<vmem>>, vector<1x32xf32>
    %c2 = arith.constant 2 : index
    %c0_5 = arith.constant 0 : index
    %4 = vector.load %arg4[%c2, %c0_5] : memref<8x192xf32, #tpu.memory_space<vmem>>, vector<1x32xf32>
    %c2_6 = arith.constant 2 : index
    %c32_7 = arith.constant 32 : index
    %5 = vector.load %arg4[%c2_6, %c32_7] : memref<8x192xf32, #tpu.memory_space<vmem>>, vector<1x32xf32>
    %cst = arith.constant dense<0.000000e+00> : vector<16xf32>
    %6 = vector.multi_reduction <add>, %0, %cst [1] : vector<16x32xf32> to vector<16xf32>
    %7 = vector.shape_cast %6 : vector<16xf32> to vector<16x1xf32>
    %cst_8 = arith.constant 3.200000e+01 : f32
    %8 = vector.broadcast %cst_8 : f32 to vector<16x1xf32>
    %9 = arith.divf %7, %8 : vector<16x1xf32>
    %10 = vector.broadcast %9 : vector<16x1xf32> to vector<16x32xf32>
    %11 = arith.subf %0, %10 : vector<16x32xf32>
    %12 = arith.mulf %11, %11 : vector<16x32xf32>
    %cst_9 = arith.constant dense<0.000000e+00> : vector<16xf32>
    %13 = vector.multi_reduction <add>, %12, %cst_9 [1] : vector<16x32xf32> to vector<16xf32>
    %14 = vector.shape_cast %13 : vector<16xf32> to vector<16x1xf32>
    %cst_10 = arith.constant 3.200000e+01 : f32
    %15 = vector.broadcast %cst_10 : f32 to vector<16x1xf32>
    %16 = arith.divf %14, %15 : vector<16x1xf32>
    %17 = vector.broadcast %9 : vector<16x1xf32> to vector<16x32xf32>
    %18 = arith.subf %0, %17 : vector<16x32xf32>
    %cst_11 = arith.constant 9.99999974E-6 : f32
    %19 = vector.broadcast %cst_11 : f32 to vector<16x1xf32>
    %20 = arith.addf %16, %19 : vector<16x1xf32>
    %21 = math.rsqrt %20 : vector<16x1xf32>
    %22 = vector.broadcast %21 : vector<16x1xf32> to vector<16x32xf32>
    %23 = arith.mulf %18, %22 : vector<16x32xf32>
    %24 = vector.broadcast %2 : vector<1x32xf32> to vector<16x32xf32>
    %25 = arith.mulf %23, %24 : vector<16x32xf32>
    %26 = vector.broadcast %4 : vector<1x32xf32> to vector<16x32xf32>
    %27 = arith.addf %25, %26 : vector<16x32xf32>
    %c0_12 = arith.constant 0 : index
    %c0_13 = arith.constant 0 : index
    %28 = vector.load %arg3[%c0_12, %c0_13] : memref<32x192xf32, #tpu.memory_space<vmem>>, vector<32x192xf32>
    %cst_14 = arith.constant dense<0.000000e+00> : vector<16x192xf32>
    %29 = tpu.matmul %27, %28, %cst_14 {dimension_numbers = #tpu.dot_dimension_numbers<[1], [0], [0], [1], [0, 0, 1, 1], [], []>} : vector<16x32xf32>, vector<32x192xf32>, vector<16x192xf32> -> vector<16x192xf32>
    %30 = vector.broadcast %1 : vector<1x192xf32> to vector<16x192xf32>
    %31 = arith.addf %29, %30 : vector<16x192xf32>
    %c0_15 = arith.constant 0 : index
    %c0_16 = arith.constant 0 : index
    %32 = vector.load %arg2[%c0_15, %c0_16] : memref<16x256xf32, #tpu.memory_space<vmem>>, vector<16x96xf32>
    %c0_17 = arith.constant 0 : index
    %c96 = arith.constant 96 : index
    %33 = vector.load %arg2[%c0_17, %c96] : memref<16x256xf32, #tpu.memory_space<vmem>>, vector<16x96xf32>
    %c0_18 = arith.constant 0 : index
    %c192 = arith.constant 192 : index
    %34 = vector.load %arg2[%c0_18, %c192] : memref<16x256xf32, #tpu.memory_space<vmem>>, vector<16x64xf32>
    %35 = vector.extract_strided_slice %31 {offsets = [0, 0], sizes = [16, 96], strides = [1, 1]} : vector<16x192xf32> to vector<16x96xf32>
    %36 = arith.mulf %35, %32 : vector<16x96xf32>
    %37 = vector.extract_strided_slice %31 {offsets = [0, 96], sizes = [16, 96], strides = [1, 1]} : vector<16x192xf32> to vector<16x96xf32>
    %38 = arith.mulf %37, %33 : vector<16x96xf32>
    %39 = arith.addf %36, %38 : vector<16x96xf32>
    %40 = vector.extract_strided_slice %39 {offsets = [0, 0], sizes = [16, 32], strides = [1, 1]} : vector<16x96xf32> to vector<16x32xf32>
    %41 = vector.extract_strided_slice %39 {offsets = [0, 32], sizes = [16, 64], strides = [1, 1]} : vector<16x96xf32> to vector<16x64xf32>
    %c0_19 = arith.constant 0 : index
    %c0_20 = arith.constant 0 : index
    %42 = vector.load %arg8[%c0_19, %c0_20] : memref<64x32xf32, #tpu.memory_space<vmem>>, vector<64x32xf32>
    %43 = tpu.concatenate %41, %41, %41, %41 in 0 : vector<16x64xf32>, vector<16x64xf32>, vector<16x64xf32>, vector<16x64xf32> -> vector<64x64xf32>
    %44 = vector.extract_strided_slice %43 {offsets = [0, 0], sizes = [64, 32], strides = [1, 1]} : vector<64x64xf32> to vector<64x32xf32>
    %45 = arith.mulf %44, %42 : vector<64x32xf32>
    %46 = vector.extract_strided_slice %43 {offsets = [0, 32], sizes = [64, 32], strides = [1, 1]} : vector<64x64xf32> to vector<64x32xf32>
    %47 = arith.mulf %46, %42 : vector<64x32xf32>
    %cst_21 = arith.constant dense<0.000000e+00> : vector<16x64xf32>
    %48 = tpu.matmul %40, %45, %cst_21 {dimension_numbers = #tpu.dot_dimension_numbers<[1], [1], [0], [0], [0, 0, 1, 0], [], []>} : vector<16x32xf32>, vector<64x32xf32>, vector<16x64xf32> -> vector<16x64xf32>
    %49 = arith.addf %48, %34 : vector<16x64xf32>
    %cst_22 = arith.constant dense<0xFF800000> : vector<16xf32>
    %50 = vector.multi_reduction <maximumf>, %49, %cst_22 [1] : vector<16x64xf32> to vector<16xf32>
    %51 = vector.shape_cast %50 : vector<16xf32> to vector<16x1xf32>
    %52 = vector.broadcast %51 : vector<16x1xf32> to vector<16x64xf32>
    %53 = arith.subf %49, %52 : vector<16x64xf32>
    %54 = math.exp %53 : vector<16x64xf32>
    %cst_23 = arith.constant dense<0.000000e+00> : vector<16x32xf32>
    %55 = tpu.matmul %54, %47, %cst_23 {dimension_numbers = #tpu.dot_dimension_numbers<[1], [0], [0], [1], [0, 0, 1, 1], [], []>} : vector<16x64xf32>, vector<64x32xf32>, vector<16x32xf32> -> vector<16x32xf32>
    %cst_24 = arith.constant dense<0.000000e+00> : vector<16x32xf32>
    %56 = tpu.matmul %54, %42, %cst_24 {dimension_numbers = #tpu.dot_dimension_numbers<[1], [0], [0], [1], [0, 0, 1, 1], [], []>} : vector<16x64xf32>, vector<64x32xf32>, vector<16x32xf32> -> vector<16x32xf32>
    %57 = arith.divf %55, %56 : vector<16x32xf32>
    %c0_25 = arith.constant 0 : index
    %c0_26 = arith.constant 0 : index
    %58 = vector.load %arg5[%c0_25, %c0_26] : memref<32x32xf32, #tpu.memory_space<vmem>>, vector<32x32xf32>
    %cst_27 = arith.constant dense<0.000000e+00> : vector<16x32xf32>
    %59 = tpu.matmul %57, %58, %cst_27 {dimension_numbers = #tpu.dot_dimension_numbers<[1], [0], [0], [1], [0, 0, 1, 1], [], []>} : vector<16x32xf32>, vector<32x32xf32>, vector<16x32xf32> -> vector<16x32xf32>
    %60 = arith.addf %0, %59 : vector<16x32xf32>
    %cst_28 = arith.constant dense<0.000000e+00> : vector<16xf32>
    %61 = vector.multi_reduction <add>, %60, %cst_28 [1] : vector<16x32xf32> to vector<16xf32>
    %62 = vector.shape_cast %61 : vector<16xf32> to vector<16x1xf32>
    %cst_29 = arith.constant 3.200000e+01 : f32
    %63 = vector.broadcast %cst_29 : f32 to vector<16x1xf32>
    %64 = arith.divf %62, %63 : vector<16x1xf32>
    %65 = vector.broadcast %64 : vector<16x1xf32> to vector<16x32xf32>
    %66 = arith.subf %60, %65 : vector<16x32xf32>
    %67 = arith.mulf %66, %66 : vector<16x32xf32>
    %cst_30 = arith.constant dense<0.000000e+00> : vector<16xf32>
    %68 = vector.multi_reduction <add>, %67, %cst_30 [1] : vector<16x32xf32> to vector<16xf32>
    %69 = vector.shape_cast %68 : vector<16xf32> to vector<16x1xf32>
    %cst_31 = arith.constant 3.200000e+01 : f32
    %70 = vector.broadcast %cst_31 : f32 to vector<16x1xf32>
    %71 = arith.divf %69, %70 : vector<16x1xf32>
    %72 = vector.broadcast %64 : vector<16x1xf32> to vector<16x32xf32>
    %73 = arith.subf %60, %72 : vector<16x32xf32>
    %cst_32 = arith.constant 9.99999974E-6 : f32
    %74 = vector.broadcast %cst_32 : f32 to vector<16x1xf32>
    %75 = arith.addf %71, %74 : vector<16x1xf32>
    %76 = math.rsqrt %75 : vector<16x1xf32>
    %77 = vector.broadcast %76 : vector<16x1xf32> to vector<16x32xf32>
    %78 = arith.mulf %73, %77 : vector<16x32xf32>
    %79 = vector.broadcast %3 : vector<1x32xf32> to vector<16x32xf32>
    %80 = arith.mulf %78, %79 : vector<16x32xf32>
    %81 = vector.broadcast %5 : vector<1x32xf32> to vector<16x32xf32>
    %82 = arith.addf %80, %81 : vector<16x32xf32>
    %c0_33 = arith.constant 0 : index
    %c0_34 = arith.constant 0 : index
    %83 = vector.load %arg6[%c0_33, %c0_34] : memref<32x128xf32, #tpu.memory_space<vmem>>, vector<32x128xf32>
    %cst_35 = arith.constant dense<0.000000e+00> : vector<16x128xf32>
    %84 = tpu.matmul %82, %83, %cst_35 {dimension_numbers = #tpu.dot_dimension_numbers<[1], [0], [0], [1], [0, 0, 1, 1], [], []>} : vector<16x32xf32>, vector<32x128xf32>, vector<16x128xf32> -> vector<16x128xf32>
    %85 = vector.extract_strided_slice %84 {offsets = [0, 0], sizes = [16, 64], strides = [1, 1]} : vector<16x128xf32> to vector<16x64xf32>
    %86 = vector.extract_strided_slice %84 {offsets = [0, 64], sizes = [16, 64], strides = [1, 1]} : vector<16x128xf32> to vector<16x64xf32>
    %87 = arith.negf %85 : vector<16x64xf32>
    %88 = math.exp %87 : vector<16x64xf32>
    %cst_36 = arith.constant 1.000000e+00 : f32
    %89 = vector.broadcast %cst_36 : f32 to vector<16x64xf32>
    %90 = arith.addf %89, %88 : vector<16x64xf32>
    %91 = arith.divf %89, %90 : vector<16x64xf32>
    %92 = arith.mulf %85, %91 : vector<16x64xf32>
    %93 = arith.mulf %92, %86 : vector<16x64xf32>
    %c0_37 = arith.constant 0 : index
    %c0_38 = arith.constant 0 : index
    %94 = vector.load %arg7[%c0_37, %c0_38] : memref<64x32xf32, #tpu.memory_space<vmem>>, vector<64x32xf32>
    %cst_39 = arith.constant dense<0.000000e+00> : vector<16x32xf32>
    %95 = tpu.matmul %93, %94, %cst_39 {dimension_numbers = #tpu.dot_dimension_numbers<[1], [0], [0], [1], [0, 0, 1, 1], [], []>} : vector<16x64xf32>, vector<64x32xf32>, vector<16x32xf32> -> vector<16x32xf32>
    %96 = arith.addf %60, %95 : vector<16x32xf32>
    %c0_40 = arith.constant 0 : index
    %c0_41 = arith.constant 0 : index
    %97 = vector.load %arg9[%c0_40, %c0_41] : memref<16x32xf32, #tpu.memory_space<vmem>>, vector<16x32xf32>
    tpu.vector_store %arg9[%c0_40, %c0_41], %96 {strides = array<i32>} : memref<16x32xf32, #tpu.memory_space<vmem>>, vector<16x32xf32>,
    return
  }
  func.func @transform_0(%arg0: i32) -> (i32, i32) {
    %c0_i32 = arith.constant 0 : i32
    %c0_i32_0 = arith.constant 0 : i32
    %c0_i32_1 = arith.constant 0 : i32
    return %c0_i32, %c0_i32_0 : i32, i32
  }
  func.func @transform_1(%arg0: i32) -> (i32, i32) {
    %c0_i32 = arith.constant 0 : i32
    %c0_i32_0 = arith.constant 0 : i32
    %c0_i32_1 = arith.constant 0 : i32
    return %c0_i32, %c0_i32_0 : i32, i32
  }
  func.func @transform_2(%arg0: i32) -> (i32, i32) {
    %c0_i32 = arith.constant 0 : i32
    %c0_i32_0 = arith.constant 0 : i32
    %c0_i32_1 = arith.constant 0 : i32
    return %c0_i32, %c0_i32_0 : i32, i32
  }
  func.func @transform_3(%arg0: i32) -> (i32, i32) {
    %c0_i32 = arith.constant 0 : i32
    %c0_i32_0 = arith.constant 0 : i32
    %c0_i32_1 = arith.constant 0 : i32
    return %c0_i32, %c0_i32_0 : i32, i32
  }
  func.func @transform_4(%arg0: i32) -> (i32, i32) {
    %c0_i32 = arith.constant 0 : i32
    %c0_i32_0 = arith.constant 0 : i32
    %c0_i32_1 = arith.constant 0 : i32
    return %c0_i32, %c0_i32_0 : i32, i32
  }
  func.func @transform_5(%arg0: i32) -> (i32, i32) {
    %c0_i32 = arith.constant 0 : i32
    %c0_i32_0 = arith.constant 0 : i32
    %c0_i32_1 = arith.constant 0 : i32
    return %c0_i32, %c0_i32_0 : i32, i32
  }
  func.func @transform_6(%arg0: i32) -> (i32, i32) {
    %c0_i32 = arith.constant 0 : i32
    %c0_i32_0 = arith.constant 0 : i32
    %c0_i32_1 = arith.constant 0 : i32
    return %c0_i32, %c0_i32_0 : i32, i32
  }
  func.func @transform_7(%arg0: i32) -> (i32, i32) {
    %c0_i32 = arith.constant 0 : i32
    %c0_i32_0 = arith.constant 0 : i32
    %c0_i32_1 = arith.constant 0 : i32
    return %c0_i32, %c0_i32_0 : i32, i32
  }
  func.func @transform_8(%arg0: i32) -> (i32, i32) {
    %c0_i32 = arith.constant 0 : i32
    %c0_i32_0 = arith.constant 0 : i32
    %c0_i32_1 = arith.constant 0 : i32
    return %c0_i32, %c0_i32_0 : i32, i32
  }
}

</mosaic_0001>

<bundles_post_ra>
// kernel: tpu_custom_call.1
= control target key start
LH: loop header
LB: loop body
LE: loop exit
PB: predicated region body
PF: predicated region fallthrough
CT: control target
= control target key end

     0   :  { %13 = vsyncpa [#allocation3], 0  ;;  %s1771_s0 = inlined_call_operand.hbm [shape: f32[16,32], index: 0, kind: input, shape index: {}]   ;;  %s1772_s1 = inlined_call_operand.vmem [shape: f32[16,256], index: 1, kind: input, shape index: {}]   ;;  %s1773_s2 = inlined_call_operand.vmem [shape: f32[32,192], index: 2, kind: input, shape index: {}]   ;;  %s1774_s3 = inlined_call_operand.hbm [shape: f32[8,192], index: 3, kind: input, shape index: {}]   ;;  %s1775_s4 = inlined_call_operand.vmem [shape: f32[32,32], index: 4, kind: input, shape index: {}]   ;;  %s1776_s5 = inlined_call_operand.vmem [shape: f32[32,128], index: 5, kind: input, shape index: {}]   ;;  %s1777_s6 = inlined_call_operand.vmem [shape: f32[64,32], index: 6, kind: input, shape index: {}]   ;;  %s1778_s7 = inlined_call_operand.vmem [shape: f32[64,32], index: 7, kind: input, shape index: {}]   ;;  %s1779_s8 = inlined_call_operand.hbm [shape: f32[16,32], index: 8, kind: output, shape index: {}]  }
   0x1   :  { %14 = vsyncpa [#allocation6], 0 }
   0x2   :  { %15 = vsyncpa [#allocation4], 0  ;;  %s1399_s27 = smov [#allocation2]   ;;  %s1327_s9 = scalar_lea.hbm %s1771_s0, 256 }
   0x3   :  { %s21_s28 = sshll.u32 %s1399_s27, 4  ;;  %p1328_p0 = scmp.ne.s32.totalorder %s1771_s0, %s1327_s9  ;;  %s22_s28 = int_to_ptr.vmem [resolvable:$true] %s21_s28 }
   0x4   :  { %p1331_p1 = scmp.lt.u32.totalorder %s1327_s9, %s1771_s0 }
   0x6   :  { %p1333_p2 = pnand %p1331_p1, %p1328_p0 }
   0x8   :  { %1336 = shalt.err (!%p1333_p2)
}
   0x9   :  { %s1337_s14 = scalar_lea.vmem %s22_s28, 256  ;;  %p1342_p4 = scmp.lt.s32.totalorder %s22_s28, %s22_s28 }
   0xa   :  { %p1338_p3 = scmp.ne.s32.totalorder %s22_s28, %s1337_s14  ;;  %p1343_p5 = scmp.lt.s32.totalorder %s1337_s14, %s1337_s14 }
   0xc   :  { %p1344_p6 = por %p1343_p5, %p1342_p4 }
   0xe   :  { %p1345_p7 = pnand %p1344_p6, %p1338_p3 }
  0x10   :  { %1348 = shalt.err (!%p1345_p7)
}
  0x11   :  { %s1400_s15 = smov 128   ;;  %s1401_s16 = smov 8  }
  0x12   :  { %27 = dma.hbm_to_vmem [thread:$0]  %s1771_s0, 256, %s22_s28, [#allocation3], %s1400_s15, %s1400_s15, %s1401_s16  }
  0x13   :  { %s1402_s19 = smov [#allocation5]   ;;  %s1349_s23 = scalar_lea.hbm %s1774_s3, 256 }
  0x14   :  { %s38_s20 = sshll.u32 %s1402_s19, 4  ;;  %p1350_p8 = scmp.ne.s32.totalorder %s1774_s3, %s1349_s23  ;;  %s39_s20 = int_to_ptr.vmem [resolvable:$true] %s38_s20 }
  0x15   :  { %p1353_p9 = scmp.lt.u32.totalorder %s1349_s23, %s1774_s3 }
  0x17   :  { %p1355_p10 = pnand %p1353_p9, %p1350_p8 }
  0x19   :  { %1358 = shalt.err (!%p1355_p10)
}
  0x1a   :  { %s1359_s29 = scalar_lea.vmem %s39_s20, 256  ;;  %p1364_p12 = scmp.lt.s32.totalorder %s39_s20, %s39_s20 }
  0x1b   :  { %p1360_p11 = scmp.ne.s32.totalorder %s39_s20, %s1359_s29  ;;  %p1365_p13 = scmp.lt.s32.totalorder %s1359_s29, %s1359_s29 }
  0x1d   :  { %p1366_p0 = por %p1365_p13, %p1364_p12 }
  0x1f   :  { %p1367_p1 = pnand %p1366_p0, %p1360_p11 }
  0x21   :  { %1370 = shalt.err (!%p1367_p1)
}
  0x22   :  { %41 = dma.hbm_to_vmem [thread:$0]  %s1774_s3, 256, %s39_s20, [#allocation6]  }
  0x23   :  { %1393 = dma.done.wait [#allocation3], 256  }
  0x24   :  { %1394 = vsyncadd [#allocation3], 4294967040 }
  0x25   :  { %1395 = dma.done.wait [#allocation6], 256  }
  0x26   :  { %1396 = vsyncadd [#allocation6], 4294967040  ;;  %vm61_vm0 = vcmask 261120   ;;  %v1480_v0 = vld [vmem:[#allocation2] sm:$0xff]  ;;  %v1482_v1 = vld [vmem:[#allocation2 + $0x8] sm:$0xff]  ;;  %v1403_v21 = vmov 0.0   ;;  %v102_v43 = vlaneseq }
  0x27   :  { %v62_v2 = vsel %vm61_vm0, %v1480_v0, 0.0  ;;  %v65_v3 = vsel %vm61_vm0, %v1482_v1, 0.0  ;;  %v94_v14 = vld [vmem:[%s1773_s2 + $0x8] sm:$0xff]  ;;  %v96_v15 = vld [vmem:[%s1773_s2 + $0x18] sm:$0xff]  ;;  %v93_v16 = vld [vmem:[%s1773_s2] sm:$0xff]  ;;  %182 = vmatprep.mubr.f32.mxu0 %v1403_v21  ;;  %s1404_s28 = smov 32  }
  0x28   :  { %63 = vadd.xlane.f32.xlu0 %v62_v2  ;;  %v1158_v17 = vpack.c.bf16 %v96_v15, %v94_v14  ;;  %v95_v18 = vld [vmem:[%s1773_s2 + $0x10] sm:$0xff]  ;;  %v98_v19 = vld [vmem:[%s1773_s2 + $0x28] sm:$0xff]  ;;  %v100_v20 = vld [vmem:[%s1773_s2 + $0x38] sm:$0xff]  ;;  %v103_v44 = vshrl.u32 %v102_v43, 7  ;;  %s1406_s25 = smov 64   ;;  %vm434_vm2 = vcmask 523264  }
  0x29   :  { %v1160_v22 = vpack.c.bf16 %v95_v18, %v93_v16  ;;  %v1162_v23 = vpack.c.bf16 %v100_v20, %v98_v19  ;;  %v97_v24 = vld [vmem:[%s1773_s2 + $0x20] sm:$0xff]  ;;  %v99_v25 = vld [vmem:[%s1773_s2 + $0x30] sm:$0xff]  ;;  %v1532_v54 = vld [vmem:[%s1772_s1 + $0x8] sm:$0xff] }
  0x2a   :  { %1159 = vmatprep.subr.bf16.mxu0 %v1158_v17  ;;  %v1164_v26 = vpack.c.bf16 %v99_v25, %v97_v24  ;;  %v1516_v34 = vld [vmem:[#allocation5 + $0x1] ss:$0 sm:$0xff]  ;;  %v1518_v36 = vld [vmem:[#allocation5 + $0x2] ss:$0 sm:$0xff]  ;;  %v104_v45 = vsub.s32 0, %v103_v44  ;;  %v108_v47 = vsub.s32 1, %v103_v44  ;;  %vm1630_vm1 = vmpackc.low %vm61_vm0, %vm61_vm0 }
  0x2b   :  { %1161 = vmatpush1.bf16.msra.mxu0 %v1160_v22  ;;  %v58_v46 = vld [vmem:[#allocation5] ss:$8 sm:$0x3]  ;;  %v195_v51 = vld [vmem:[%s1772_s1] sm:$0xff] }
  0x2c   :  { %66 = vadd.xlane.f32.xlu0 %v65_v3  ;;  %1163 = vmatprep.subr.bf16.mxu0 %v1162_v23  ;;  %v105_v48 = vrot.slane %v58_v46, %v104_v45  ;;  %v109_v49 = vrot.slane %v58_v46, %v108_v47  ;;  %v196_v59 = vld [vmem:[%s1772_s1 + $0x10] sm:$0xff]  ;;  %v1541_v62 = vld [vmem:[%s1778_s7] sm:$0xff]  ;;  %v200_v3 = vld [vmem:[%s1772_s1 + $0x18] sm:$0xff] }
  0x2f   :  { %1165 = vmatpush1.bf16.msra.mxu0 %v1164_v26 }
  0xb5   :  { %v64_v4 = vpop.xlane.xlu0 %63 }
  0xb6   :  { %v69_v5 = vmul.f32 0.03125, %v64_v4  ;;  %v1550_v4 = vld [vmem:[%s1778_s7 + $0x10] sm:$0xff] }
  0xb8   :  { %v71_v6 = vsub.f32 %v1480_v0, %v69_v5 }
  0xb9   :  { %v67_v7 = vpop.xlane.xlu0 %66 }
  0xba   :  { %v70_v8 = vmul.f32 0.03125, %v67_v7  ;;  %v73_v9 = vmul.f32 %v71_v6, %v71_v6  ;;  %v1561_v7 = vld [vmem:[%s1778_s7 + $0x8] sm:$0xff] }
  0xbc   :  { %v72_v10 = vsub.f32 %v1482_v1, %v70_v8  ;;  %v75_v11 = vsel %vm61_vm0, %v73_v9, 0.0  ;;  %v1568_v8 = vld [vmem:[%s1778_s7 + $0x30] sm:$0xff]  ;;  %v1573_v9 = vld [vmem:[%s1778_s7 + $0x18] sm:$0xff] }
  0xbd   :  { %76 = vadd.xlane.f32.xlu1 %v75_v11  ;;  %v1586_v11 = vld [vmem:[%s1778_s7 + $0x38] sm:$0xff] }
  0xbe   :  { %v74_v12 = vmul.f32 %v72_v10, %v72_v10 }
  0xc0   :  { %v78_v13 = vsel %vm61_vm0, %v74_v12, 0.0 }
  0xc1   :  { %79 = vadd.xlane.f32.xlu1 %v78_v13 }
 0x14a   :  { %v77_v27 = vpop.xlane.xlu1 %76 }
 0x14b   :  { %v81_v28 = vmul.f32 0.03125, %v77_v27 }
 0x14d   :  { %v83_v29 = vadd.f32 1e-05, %v81_v28 }
 0x14e   :  { %v80_v30 = vpop.xlane.xlu1 %79 }
 0x14f   :  { %1303 = vrsqrt.f32 %v83_v29  ;;  %v82_v31 = vmul.f32 0.03125, %v80_v30 }
 0x151   :  { %v84_v32 = vadd.f32 1e-05, %v82_v31 }
 0x153   :  { %1305 = vrsqrt.f32 %v84_v32 }
 0x159   :  { %v1304_v33 = vpop.eup %1303 }
 0x15a   :  { %v87_v35 = vmul.f32 %v1304_v33, %v71_v6  ;;  %v1556_v6 = vld [vmem:[%s1778_s7 + $0x20] sm:$0xff] }
 0x15c   :  { %v89_v37 = vmul.f32 %v87_v35, %v1516_v34 }
 0x15d   :  { %v1306_v38 = vpop.eup %1305 }
 0x15e   :  { %v91_v39 = vadd.f32 %v89_v37, %v1518_v36  ;;  %v88_v40 = vmul.f32 %v1306_v38, %v72_v10  ;;  %v1580_v10 = vld [vmem:[%s1778_s7 + $0x28] sm:$0xff]  ;;  %s1405_s7 = smov 96  }
 0x160   :  { %984 = vmatmul.mubr.msk.f32.vlgmr.msra.gmra.mrb[0].mxu0 %vm61_vm0, %v91_v39  ;;  %v90_v41 = vmul.f32 %v88_v40, %v1516_v34 }
 0x161   :  { %188 = vmatprep.mubr.f32.mxu0 %v1403_v21 }
 0x162   :  { %v92_v42 = vadd.f32 %v90_v41, %v1518_v36 }
 0x164   :  { %985 = vmatmul.mubr.msk.f32.gmra.mrb[2].mxu0 %vm61_vm0, %v92_v42 }
 0x233   :  { %v184_v50 = vpop.f32.mrb[0].mxu0 }
 0x234   :  { %v185_v52 = vadd.f32 %v184_v50, %v105_v48  ;;  %v186_v53 = vpop.f32.mrb[1].mxu0 }
 0x235   :  { %v187_v55 = vadd.f32 %v186_v53, %v109_v49 }
 0x236   :  { %v201_v56 = vmul.f32 %v195_v51, %v185_v52 }
 0x237   :  { %v204_v57 = vmul.f32 %v1532_v54, %v187_v55  ;;  %v190_v58 = vpop.f32.mrb[2].mxu0 }
 0x238   :  { %v191_v60 = vadd.f32 %v190_v58, %v105_v48  ;;  %211 = vrot.lane.b32.xlu0 %v201_v56, %s1404_s28  ;;  %v192_v61 = vpop.f32.mrb[3].mxu0 }
 0x239   :  { %213 = vrot.lane.b32.xlu1 %v204_v57, %s1404_s28  ;;  %v193_v2 = vadd.f32 %v192_v61, %v109_v49 }
 0x23a   :  { %v202_v63 = vmul.f32 %v196_v59, %v191_v60 }
 0x23b   :  { %v206_v5 = vmul.f32 %v200_v3, %v193_v2 }
 0x23c   :  { %241 = vrot.lane.b32.xlu0 %v1541_v62, %s1404_s28 }
 0x23d   :  { %215 = vrot.lane.b32.xlu1 %v202_v63, %s1404_s28 }
 0x240   :  { %245 = vrot.lane.b32.xlu0 %v1550_v4, %s1404_s28 }
 0x241   :  { %217 = vrot.lane.b32.xlu1 %v206_v5, %s1404_s28 }
 0x244   :  { %249 = vrot.lane.b32.xlu0 %v1556_v6, %s1404_s28 }
 0x245   :  { %243 = vrot.lane.b32.xlu1 %v1561_v7, %s1404_s28 }
 0x248   :  { %253 = vrot.lane.b32.xlu0 %v1568_v8, %s1404_s28 }
 0x249   :  { %247 = vrot.lane.b32.xlu1 %v1573_v9, %s1404_s28 }
 0x24d   :  { %251 = vrot.lane.b32.xlu1 %v1580_v10, %s1404_s28 }
 0x251   :  { %255 = vrot.lane.b32.xlu1 %v1586_v11, %s1404_s28 }
 0x2aa   :  { %v212_v12 = vpop.permute.xlu0 %211 }
 0x2ab   :  { %v214_v13 = vpop.permute.xlu1 %213 }
 0x2ac   :  { %v219_v14 = vsel %vm61_vm0, %v212_v12, %v214_v13 }
 0x2ad   :  { %v1590_v15 = vadd.f32 %v219_v14, %v201_v56 }
 0x2ae   :  { %v242_v16 = vpop.permute.xlu0 %241 }
 0x2af   :  { %v216_v17 = vpop.permute.xlu1 %215  ;;  %1076 = vmatprep.mubr.msk.f32.mxu1 %vm61_vm0, %v1590_v15  ;;  %v265_v23 = vmul.f32 %v242_v16, %v1590_v15 }
 0x2b2   :  { %v246_v20 = vpop.permute.xlu0 %245 }
 0x2b3   :  { %v218_v18 = vpop.permute.xlu1 %217  ;;  %v267_v28 = vmul.f32 %v246_v20, %v1590_v15 }
 0x2b4   :  { %v220_v19 = vsel %vm61_vm0, %v216_v17, %v218_v18 }
 0x2b5   :  { %v1595_v21 = vadd.f32 %v220_v19, %v202_v63 }
 0x2b6   :  { %v250_v26 = vpop.permute.xlu0 %249 }
 0x2b7   :  { %v244_v22 = vpop.permute.xlu1 %243  ;;  %v269_v32 = vmul.f32 %v250_v26, %v1590_v15 }
 0x2b8   :  { %v266_v24 = vmul.f32 %v244_v22, %v1595_v21 }
 0x2ba   :  { %v1263_v25 = vpack.i.bf16 %v266_v24, %v265_v23  ;;  %v254_v35 = vpop.permute.xlu0 %253 }
 0x2bb   :  { %v248_v27 = vpop.permute.xlu1 %247  ;;  %v271_v39 = vmul.f32 %v254_v35, %v1590_v15 }
 0x2bc   :  { %v268_v29 = vmul.f32 %v248_v27, %v1595_v21  ;;  %1264 = vrot.lane.b32.xlu0 %v1263_v25, %s1405_s7 }
 0x2be   :  { %v1268_v30 = vpack.i.bf16 %v268_v29, %v267_v28 }
 0x2bf   :  { %v252_v31 = vpop.permute.xlu1 %251 }
 0x2c0   :  { %v270_v33 = vmul.f32 %v252_v31, %v1595_v21  ;;  %1269 = vrot.lane.b32.xlu1 %v1268_v30, %s1405_s7 }
 0x2c2   :  { %v1273_v37 = vpack.i.bf16 %v270_v33, %v269_v32 }
 0x2c3   :  { %v256_v38 = vpop.permute.xlu1 %255 }
 0x2c4   :  { %v272_v40 = vmul.f32 %v256_v38, %v1595_v21  ;;  %1274 = vrot.lane.b32.xlu0 %v1273_v37, %s1405_s7 }
 0x2c6   :  { %v1278_v41 = vpack.i.bf16 %v272_v40, %v271_v39 }
 0x2c8   :  { %331 = vrot.lane.b32.xlu0 %v1532_v54, %s1406_s25  ;;  %1279 = vrot.lane.b32.xlu1 %v1278_v41, %s1405_s7 }
 0x2cc   :  { %273 = vrot.lane.b32.xlu0 %v1541_v62, %s1406_s25  ;;  %333 = vrot.lane.b32.xlu1 %v200_v3, %s1406_s25 }
 0x2d0   :  { %277 = vrot.lane.b32.xlu0 %v1550_v4, %s1406_s25  ;;  %275 = vrot.lane.b32.xlu1 %v1561_v7, %s1406_s25 }
 0x2d4   :  { %281 = vrot.lane.b32.xlu0 %v1556_v6, %s1406_s25  ;;  %279 = vrot.lane.b32.xlu1 %v1573_v9, %s1406_s25 }
 0x2d8   :  { %285 = vrot.lane.b32.xlu0 %v1568_v8, %s1406_s25  ;;  %283 = vrot.lane.b32.xlu1 %v1580_v10, %s1406_s25 }
 0x2dc   :  { %287 = vrot.lane.b32.xlu1 %v1586_v11, %s1406_s25 }
 0x32e   :  { %v1265_v42 = vpop.permute.xlu0 %1264 }
 0x32f   :  { %v1267_v43 = vunpack.i.h.bf16 %v1265_v42  ;;  %v1266_v44 = vunpack.i.l.bf16 %v1265_v42 }
 0x331   :  { %v1166_v46 = vpack.c.bf16 %v1267_v43, %v1266_v44 }
 0x332   :  { %v1270_v47 = vpop.permute.xlu1 %1269 }
 0x333   :  { %v1272_v48 = vunpack.i.h.bf16 %v1270_v47  ;;  %v1271_v49 = vunpack.i.l.bf16 %v1270_v47  ;;  %1168 = vmatprep.subr.msk.bf16.mxu1 %vm1630_vm1, %v1166_v46 }
 0x334   :  { %1171 = vmatpush3.bf16.xpose.msk.msra.mxu1 %vm1630_vm1, %v1166_v46 }
 0x335   :  { %v1172_v50 = vpack.c.bf16 %v1272_v48, %v1271_v49 }
 0x336   :  { %v1275_v51 = vpop.permute.xlu0 %1274 }
 0x337   :  { %v1277_v52 = vunpack.i.h.bf16 %v1275_v51  ;;  %v1276_v53 = vunpack.i.l.bf16 %v1275_v51  ;;  %1174 = vmatprep.subr.msk.bf16.mxu1 %vm1630_vm1, %v1172_v50 }
 0x339   :  { %v1178_v56 = vpack.c.bf16 %v1277_v52, %v1276_v53 }
 0x33a   :  { %v1280_v54 = vpop.permute.xlu1 %1279  ;;  %v332_v55 = vpop.permute.xlu0 %331 }
 0x33b   :  { %v1282_v59 = vunpack.i.h.bf16 %v1280_v54  ;;  %v1281_v60 = vunpack.i.l.bf16 %v1280_v54 }
 0x33c   :  { %1177 = vmatpush3.bf16.xpose.msk.msra.mxu1 %vm1630_vm1, %v1172_v50 }
 0x33d   :  { %1180 = vmatprep.subr.msk.bf16.mxu1 %vm1630_vm1, %v1178_v56  ;;  %v1184_v2 = vpack.c.bf16 %v1282_v59, %v1281_v60  ;;  %v1210_v59 = vpack.c.bf16 %v1573_v9, %v1550_v4  ;;  %v639_v4 = vld [vmem:[%s1775_s4] sm:$0xff] }
 0x33e   :  { %v334_v57 = vpop.permute.xlu1 %333  ;;  %v274_v58 = vpop.permute.xlu0 %273 }
 0x33f   :  { %v297_v3 = vmul.f32 %v274_v58, %v1590_v15 }
 0x342   :  { %v276_v61 = vpop.permute.xlu1 %275  ;;  %v278_v63 = vpop.permute.xlu0 %277 }
 0x343   :  { %v298_v5 = vmul.f32 %v276_v61, %v1595_v21  ;;  %v299_v14 = vmul.f32 %v278_v63, %v1590_v15  ;;  %v1214_v61 = vpack.c.bf16 %v1580_v10, %v1556_v6  ;;  %v641_v6 = vld [vmem:[%s1775_s4 + $0x10] sm:$0xff] }
 0x344   :  { %1183 = vmatpush3.bf16.xpose.msk.msra.mxu1 %vm1630_vm1, %v1178_v56 }
 0x345   :  { %v1283_v12 = vpack.i.bf16 %v298_v5, %v297_v3  ;;  %1186 = vmatprep.subr.msk.bf16.mxu1 %vm1630_vm1, %v1184_v2 }
 0x346   :  { %v280_v13 = vpop.permute.xlu1 %279  ;;  %v282_v17 = vpop.permute.xlu0 %281 }
 0x347   :  { %v300_v16 = vmul.f32 %v280_v13, %v1595_v21  ;;  %1284 = vrot.lane.b32.xlu0 %v1283_v12, %s1406_s25  ;;  %v301_v20 = vmul.f32 %v282_v17, %v1590_v15 }
 0x349   :  { %v1288_v18 = vpack.i.bf16 %v300_v16, %v299_v14 }
 0x34a   :  { %v284_v19 = vpop.permute.xlu1 %283  ;;  %v286_v24 = vpop.permute.xlu0 %285 }
 0x34b   :  { %v302_v22 = vmul.f32 %v284_v19, %v1595_v21  ;;  %1289 = vrot.lane.b32.xlu1 %v1288_v18, %s1406_s25  ;;  %v303_v43 = vmul.f32 %v286_v24, %v1590_v15 }
 0x34c   :  { %1189 = vmatpush3.bf16.xpose.msk.msra.mxu1 %vm1630_vm1, %v1184_v2 }
 0x34d   :  { %v1293_v23 = vpack.i.bf16 %v302_v22, %v301_v20 }
 0x34e   :  { %v288_v25 = vpop.permute.xlu1 %287 }
 0x34f   :  { %v304_v42 = vmul.f32 %v288_v25, %v1595_v21 }
 0x351   :  { %v1298_v44 = vpack.i.bf16 %v304_v42, %v303_v43 }
 0x353   :  { %1077 = vmatmul.mubr.msk.f32.vlgmr.msra.gmra.mrb[0].mxu1 %vm61_vm0, %v1595_v21 }
 0x3b9   :  { %v1285_v26 = vpop.permute.xlu0 %1284 }
 0x3ba   :  { %v1287_v27 = vunpack.i.h.bf16 %v1285_v26  ;;  %v1286_v28 = vunpack.i.l.bf16 %v1285_v26 }
 0x3bc   :  { %v1190_v29 = vpack.c.bf16 %v1287_v27, %v1286_v28 }
 0x3bd   :  { %v1290_v30 = vpop.permute.xlu1 %1289 }
 0x3be   :  { %v1292_v31 = vunpack.i.h.bf16 %v1290_v30  ;;  %v1291_v32 = vunpack.i.l.bf16 %v1290_v30  ;;  %1191 = vmatprep.subr.bf16.mxu0 %v1190_v29 }
 0x3bf   :  { %1193 = vmatpush3.bf16.msra.mxu0 %v1190_v29 }
 0x3c0   :  { %v1194_v33 = vpack.c.bf16 %v1292_v31, %v1291_v32  ;;  %v765_v31 = vld [vmem:[%s1776_s5 + $0x8] sm:$0xff] }
 0x3c2   :  { %1195 = vmatprep.subr.bf16.mxu0 %v1194_v33 }
 0x3c3   :  { %1197 = vmatpush3.bf16.msra.mxu0 %v1194_v33  ;;  %v766_v33 = vld [vmem:[%s1776_s5 + $0x10] sm:$0xff] }
 0x426   :  { %v1078_v35 = vpop.f32.mrb[0].mxu1 }
 0x427   :  { %v431_v37 = vadd.f32 %v1078_v35, %v334_v57  ;;  %v425_v38 = vpop.f32.mrb[1].mxu1  ;;  %v1206_v57 = vpack.c.bf16 %v1561_v7, %v1541_v62  ;;  %v1218_v62 = vpack.c.bf16 %v1586_v11, %v1568_v8  ;;  %v640_v7 = vld [vmem:[%s1775_s4 + $0x8] sm:$0xff]  ;;  %v642_v8 = vld [vmem:[%s1775_s4 + $0x18] sm:$0xff] }
 0x428   :  { %v426_v39 = vadd.f32 %v425_v38, %v332_v55  ;;  %v1222_v9 = vpack.c.bf16 %v640_v7, %v639_v4  ;;  %v1226_v10 = vpack.c.bf16 %v642_v8, %v641_v6  ;;  %v767_v35 = vld [vmem:[%s1776_s5 + $0x18] sm:$0xff] }
 0x429   :  { %v438_v40 = vsel %vm434_vm2, %v431_v37, -inf }
 0x42a   :  { %439 = vmax.xlane.f32.xlu1 %v438_v40  ;;  %v435_v41 = vsel %vm434_vm2, %v426_v39, -inf  ;;  %1223 = vmatprep.subr.bf16.mxu1 %v1222_v9 }
 0x42b   :  { %436 = vmax.xlane.f32.xlu0 %v435_v41  ;;  %1225 = vmatpush3.bf16.msra.mxu1 %v1222_v9 }
 0x42c   :  { %1227 = vmatprep.subr.bf16.mxu1 %v1226_v10 }
 0x42f   :  { %1229 = vmatpush3.bf16.msra.mxu1 %v1226_v10 }
 0x43b   :  { %1299 = vrot.lane.b32.xlu1 %v1298_v44, %s1406_s25 }
 0x441   :  { %1294 = vrot.lane.b32.xlu0 %v1293_v23, %s1406_s25 }
 0x4b7   :  { %v440_v45 = vpop.xlane.xlu1 %439 }
 0x4b8   :  { %v442_v46 = vsub.f32 %v431_v37, %v440_v45  ;;  %v437_v47 = vpop.xlane.xlu0 %436 }
 0x4b9   :  { %v441_v48 = vsub.f32 %v426_v39, %v437_v47 }
 0x4ba   :  { %v445_v49 = vmul.f32 1.442695, %v442_v46 }
 0x4bb   :  { %v443_v50 = vmul.f32 1.442695, %v441_v48  ;;  %v1300_v51 = vpop.permute.xlu1 %1299 }
 0x4bc   :  { %v1302_v52 = vunpack.i.h.bf16 %v1300_v51  ;;  %v1295_v53 = vpop.permute.xlu0 %1294  ;;  %v1301_v54 = vunpack.i.l.bf16 %v1300_v51 }
 0x4bd   :  { %1307 = vpow2.f32 %v443_v50  ;;  %v1297_v55 = vunpack.i.h.bf16 %v1295_v53  ;;  %v1296_v21 = vunpack.i.l.bf16 %v1295_v53  ;;  %v873_v53 = vld [vmem:[%s1777_s6] sm:$0xff] }
 0x4be   :  { %1309 = vpow2.f32 %v445_v49  ;;  %v1202_v56 = vpack.c.bf16 %v1302_v52, %v1301_v54  ;;  %v874_v54 = vld [vmem:[%s1777_s6 + $0x8] sm:$0xff] }
 0x4bf   :  { %v1198_v15 = vpack.c.bf16 %v1297_v55, %v1296_v21  ;;  %v875_v55 = vld [vmem:[%s1777_s6 + $0x10] sm:$0xff]  ;;  %v1238_v21 = vpack.c.bf16 %v874_v54, %v873_v53 }
 0x4c1   :  { %1199 = vmatprep.subr.bf16.mxu0 %v1198_v15  ;;  %1239 = vmatprep.subr.bf16.mxu1 %v1238_v21 }
 0x4c2   :  { %1201 = vmatpush3.bf16.msra.mxu0 %v1198_v15  ;;  %v876_v15 = vld [vmem:[%s1777_s6 + $0x18] sm:$0xff] }
 0x4c3   :  { %1203 = vmatprep.subr.bf16.mxu0 %v1202_v56 }
 0x4c6   :  { %1205 = vmatpush3.bf16.msra.mxu0 %v1202_v56  ;;  %v1242_v56 = vpack.c.bf16 %v876_v15, %v875_v55 }
 0x4c7   :  { %v1308_v58 = vpop.eup %1307  ;;  %1207 = vmatprep.subr.bf16.mxu0 %v1206_v57 }
 0x4c8   :  { %v1310_v60 = vpop.eup %1309  ;;  %1095 = vmatprep.mubr.msk.f32.mxu0 %vm434_vm2, %v1308_v58 }
 0x4c9   :  { %1096 = vmatmul.mubr.msk.f32.vlgmr.msra.gmra.mrb[4].mxu0 %vm434_vm2, %v1310_v60 }
 0x4ca   :  { %1209 = vmatpush3.bf16.msra.mxu0 %v1206_v57  ;;  %1114 = vmatprep.mubr.msk.f32.mxu0 %vm434_vm2, %v1308_v58  ;;  %v877_v57 = vld [vmem:[%s1777_s6 + $0x20] sm:$0xff]  ;;  %v878_v58 = vld [vmem:[%s1777_s6 + $0x28] sm:$0xff] }
 0x4cb   :  { %1211 = vmatprep.subr.bf16.mxu0 %v1210_v59 }
 0x4ce   :  { %1213 = vmatpush3.bf16.msra.mxu0 %v1210_v59  ;;  %v1246_v59 = vpack.c.bf16 %v878_v58, %v877_v57 }
 0x4cf   :  { %1215 = vmatprep.subr.bf16.mxu0 %v1214_v61 }
 0x4d2   :  { %1217 = vmatpush3.bf16.msra.mxu0 %v1214_v61  ;;  %v880_v61 = vld [vmem:[%s1777_s6 + $0x38] sm:$0xff] }
 0x4d3   :  { %1219 = vmatprep.subr.bf16.mxu0 %v1218_v62 }
 0x4d6   :  { %1221 = vmatpush3.bf16.msra.mxu0 %v1218_v62 }
 0x4d9   :  { %1115 = vmatmul.mubr.msk.f32.vlgmr.msra.gmra.mrb[6].mxu0 %vm434_vm2, %v1310_v60  ;;  %v879_v60 = vld [vmem:[%s1777_s6 + $0x30] sm:$0xff]  ;;  %s1407_s6 = smov [#allocation7]  }
 0x4da   :  { %v1250_v62 = vpack.c.bf16 %v880_v61, %v879_v60 }
 0x59c   :  { %v1097_v11 = vpop.f32.mrb[4].mxu0 }
 0x59d   :  { %v551_v63 = vpop.f32.mrb[5].mxu0 }
 0x5ac   :  { %v1116_v2 = vpop.f32.mrb[6].mxu0 }
 0x5ad   :  { %1311 = vrcp.f32 %v1116_v2  ;;  %v626_v3 = vpop.f32.mrb[7].mxu0 }
 0x5ae   :  { %1313 = vrcp.f32 %v626_v3 }
 0x5b7   :  { %v1312_v5 = vpop.eup %1311 }
 0x5b8   :  { %v1314_v12 = vpop.eup %1313  ;;  %v638_v13 = vmul.f32 %v1312_v5, %v1097_v11 }
 0x5b9   :  { %v636_v14 = vmul.f32 %v1314_v12, %v551_v63 }
 0x5bb   :  { %1125 = vmatprep.mubr.msk.f32.mxu1 %vm61_vm0, %v636_v14 }
 0x5bc   :  { %1126 = vmatmul.mubr.msk.f32.vlgmr.msra.gmra.mrb[2].mxu1 %vm61_vm0, %v638_v13 }
 0x5bd   :  { %1241 = vmatpush3.bf16.msra.mxu1 %v1238_v21 }
 0x5be   :  { %1243 = vmatprep.subr.bf16.mxu1 %v1242_v56 }
 0x5c1   :  { %1245 = vmatpush3.bf16.msra.mxu1 %v1242_v56 }
 0x5c2   :  { %1247 = vmatprep.subr.bf16.mxu1 %v1246_v59 }
 0x5c5   :  { %1249 = vmatpush3.bf16.msra.mxu1 %v1246_v59 }
 0x5c6   :  { %1251 = vmatprep.subr.bf16.mxu1 %v1250_v62 }
 0x5c9   :  { %1253 = vmatpush3.bf16.msra.mxu1 %v1250_v62 }
 0x68f   :  { %v1127_v16 = vpop.f32.mrb[2].mxu1 }
 0x690   :  { %v1693_v17 = vadd.f32 %v1127_v16, %v1482_v1  ;;  %v715_v18 = vpop.f32.mrb[3].mxu1 }
 0x691   :  { %v1696_v19 = vadd.f32 %v715_v18, %v1480_v0 }
 0x692   :  { %v729_v20 = vsel %vm61_vm0, %v1693_v17, 0.0 }
 0x693   :  { %730 = vadd.xlane.f32.xlu1 %v729_v20  ;;  %v726_v22 = vsel %vm61_vm0, %v1696_v19, 0.0 }
 0x694   :  { %727 = vadd.xlane.f32.xlu0 %v726_v22 }
 0x6a4   :  { %759 = vrot.lane.b32.xlu1 %v1518_v36, %s1405_s7  ;;  %v764_v36 = vld [vmem:[%s1776_s5] sm:$0xff] }
 0x6a5   :  { %v1230_v32 = vpack.c.bf16 %v765_v31, %v764_v36 }
 0x6a7   :  { %1231 = vmatprep.subr.bf16.mxu0 %v1230_v32 }
 0x6a8   :  { %1233 = vmatpush3.bf16.msra.mxu0 %v1230_v32 }
 0x720   :  { %v731_v23 = vpop.xlane.xlu1 %730 }
 0x721   :  { %v733_v24 = vmul.f32 0.03125, %v731_v23  ;;  %v728_v25 = vpop.xlane.xlu0 %727 }
 0x722   :  { %v732_v1 = vmul.f32 0.03125, %v728_v25 }
 0x723   :  { %v735_v26 = vsub.f32 %v1693_v17, %v733_v24 }
 0x724   :  { %v734_v0 = vsub.f32 %v1696_v19, %v732_v1  ;;  %v760_v50 = vpop.permute.xlu1 %759 }
 0x725   :  { %v737_v27 = vmul.f32 %v735_v26, %v735_v26 }
 0x726   :  { %v736_v29 = vmul.f32 %v734_v0, %v734_v0 }
 0x727   :  { %v741_v28 = vsel %vm61_vm0, %v737_v27, 0.0 }
 0x728   :  { %742 = vadd.xlane.f32.xlu0 %v741_v28  ;;  %v738_v30 = vsel %vm61_vm0, %v736_v29, 0.0 }
 0x72c   :  { %739 = vadd.xlane.f32.xlu0 %v738_v30 }
 0x742   :  { %753 = vrot.lane.b32.xlu0 %v1516_v34, %s1405_s7  ;;  %v1234_v34 = vpack.c.bf16 %v767_v35, %v766_v33 }
 0x744   :  { %1235 = vmatprep.subr.bf16.mxu0 %v1234_v34 }
 0x745   :  { %1237 = vmatpush3.bf16.msra.mxu0 %v1234_v34 }
 0x7b5   :  { %v743_v37 = vpop.xlane.xlu0 %742 }
 0x7b6   :  { %v745_v38 = vmul.f32 0.03125, %v743_v37 }
 0x7b8   :  { %v747_v39 = vadd.f32 1e-05, %v745_v38 }
 0x7b9   :  { %v740_v40 = vpop.xlane.xlu0 %739 }
 0x7ba   :  { %1315 = vrsqrt.f32 %v747_v39  ;;  %v744_v41 = vmul.f32 0.03125, %v740_v40 }
 0x7bc   :  { %v746_v42 = vadd.f32 1e-05, %v744_v41 }
 0x7bd   :  { %v754_v45 = vpop.permute.xlu0 %753 }
 0x7be   :  { %1317 = vrsqrt.f32 %v746_v42 }
 0x7c4   :  { %v1316_v43 = vpop.eup %1315 }
 0x7c5   :  { %v751_v44 = vmul.f32 %v1316_v43, %v735_v26 }
 0x7c7   :  { %v757_v48 = vmul.f32 %v754_v45, %v751_v44 }
 0x7c8   :  { %v1318_v46 = vpop.eup %1317 }
 0x7c9   :  { %v750_v47 = vmul.f32 %v1318_v46, %v734_v0  ;;  %v763_v52 = vadd.f32 %v760_v50, %v757_v48 }
 0x7cb   :  { %v756_v49 = vmul.f32 %v754_v45, %v750_v47 }
 0x7cd   :  { %v762_v51 = vadd.f32 %v760_v50, %v756_v49 }
 0x7cf   :  { %1136 = vmatprep.mubr.msk.f32.mxu0 %vm61_vm0, %v762_v51 }
 0x7d0   :  { %1137 = vmatmul.mubr.msk.f32.vlgmr.msra.gmra.mrb[8].mxu0 %vm61_vm0, %v763_v52 }
 0x8a3   :  { %v1138_v4 = vpop.f32.mrb[8].mxu0 }
 0x8a4   :  { %v840_v7 = vpop.f32.mrb[9].mxu0  ;;  %v1005_v6 = vmul.f32 -1.442695, %v1138_v4 }
 0x8a5   :  { %865 = vrot.lane.b32.xlu1 %v840_v7, %s1406_s25  ;;  %v1004_v9 = vmul.f32 -1.442695, %v840_v7 }
 0x8a7   :  { %1319 = vpow2.f32 %v1004_v9 }
 0x8a8   :  { %1321 = vpow2.f32 %v1005_v6 }
 0x8a9   :  { %867 = vrot.lane.b32.xlu1 %v1138_v4, %s1406_s25  ;;  %s971_s25 = sshll.u32 %s1407_s6, 4  ;;  %s972_s25 = int_to_ptr.vmem [resolvable:$true] %s971_s25 }
 0x8aa   :  { %s1371_s30 = scalar_lea.vmem %s972_s25, 256  ;;  %p1376_p3 = scmp.lt.s32.totalorder %s972_s25, %s972_s25 }
 0x8ab   :  { %p1372_p2 = scmp.ne.s32.totalorder %s972_s25, %s1371_s30  ;;  %p1377_p4 = scmp.lt.s32.totalorder %s1371_s30, %s1371_s30 }
 0x8ad   :  { %p1378_p5 = por %p1377_p4, %p1376_p3 }
 0x8af   :  { %p1379_p6 = pnand %p1378_p5, %p1372_p2 }
 0x8b1   :  { %v1320_v8 = vpop.eup %1319 }
 0x8b2   :  { %v855_v10 = vadd.f32 1.0, %v1320_v8  ;;  %v1322_v11 = vpop.eup %1321 }
 0x8b3   :  { %v856_v63 = vadd.f32 1.0, %v1322_v11 }
 0x8b4   :  { %1323 = vrcp.f32 %v855_v10 }
 0x8b5   :  { %1325 = vrcp.f32 %v856_v63 }
 0x8be   :  { %v1324_v2 = vpop.eup %1323 }
 0x8bf   :  { %v861_v3 = vmul.f32 %v1324_v2, %v840_v7  ;;  %v1326_v5 = vpop.eup %1325 }
 0x8c0   :  { %v862_v14 = vmul.f32 %v1326_v5, %v1138_v4 }
 0x917   :  { %v866_v12 = vpop.permute.xlu1 %865 }
 0x918   :  { %v871_v13 = vmul.f32 %v866_v12, %v861_v3 }
 0x91a   :  { %1155 = vmatprep.mubr.msk.f32.mxu1 %vm434_vm2, %v871_v13 }
 0x91b   :  { %v868_v16 = vpop.permute.xlu1 %867 }
 0x91c   :  { %v872_v18 = vmul.f32 %v868_v16, %v862_v14 }
 0x91e   :  { %1156 = vmatmul.mubr.msk.f32.vlgmr.msra.gmra.mrb[4].mxu1 %vm434_vm2, %v872_v18 }
 0x9f1   :  { %v1157_v20 = vpop.f32.mrb[4].mxu1 }
 0x9f2   :  { %v963_v22 = vadd.f32 %v1157_v20, %v1693_v17  ;;  %v953_v23 = vpop.f32.mrb[5].mxu1 }
 0x9f3   :  { %v962_v24 = vadd.f32 %v953_v23, %v1696_v19 }
 0x9f4   :  { %965 = vst.msk [vmem:[#allocation7 + $0x8] sm:$0xff] %vm61_vm0, %v963_v22 }
 0x9f5   :  { %964 = vst.msk [vmem:[#allocation7] sm:$0xff] %vm61_vm0, %v962_v24 }
 0x9f6   :  { %1382 = shalt.err (!%p1379_p6)
}
 0x9f7   :  { %s1383_s10 = scalar_lea.hbm %s1779_s8, 256 }
 0x9f8   :  { %p1384_p7 = scmp.ne.s32.totalorder %s1779_s8, %s1383_s10  ;;  %p1387_p8 = scmp.lt.u32.totalorder %s1383_s10, %s1779_s8 }
 0x9fa   :  { %p1389_p9 = pnand %p1387_p8, %p1384_p7 }
 0x9fc   :  { %1392 = shalt.err (!%p1389_p9)
}
 0x9fd   :  { %977 = dma.vmem_to_hbm [thread:$0]  %s972_s25, 256, %s1779_s8, [#allocation4], %s1400_s15, %s1400_s15, %s1401_s16  }
 0x9fe   :  { %1397 = dma.done.wait [#allocation4], 256  }
 0x9ff   :  { %1398 = vsyncadd [#allocation4], 4294967040 }
 0xa00   :  { %981 = vsyncpa [#allocation3], 1 }
 0xa01   :  { %982 = vsyncpa [#allocation6], 1 }
 0xa02   :  { %983 = vsyncpa [#allocation4], 1 }

</bundles_post_ra>
